<compile_context>
chip_gen: v6e
topology: v6e:2x2x1
jax: 0.10.0
libtpu: 0.0.40
codegen_flags: <defaults>
</compile_context>

<pallas_src>
import functools

import jax
import jax.numpy as jnp
from jax import lax
from jax.experimental import pallas as pl
from jax.experimental.pallas import tpu as pltpu


def _round_up(x, m):
    return (x + m - 1) // m * m


def rbm_kernel(v_ref, w_ref, hb_ref, vb_ref, uh_ref, uv_ref, vk_ref, *, cd_k):
    # v_ref : (TB, Vp) f32      w_ref : (Hp, Vp) bf16 (resident)
    # hb_ref: (1, Hp) f32       vb_ref: (1, Vp) f32
    # uh_ref: (cd_k+1, TB, Hp) f32 uniforms for hidden samples
    # uv_ref: (cd_k,   TB, Vp) f32 uniforms for visible samples
    tb, vdim = v_ref.shape
    hdim = w_ref.shape[0]

    w = w_ref[...]                                   # bf16 weights, one copy
    v0 = v_ref[...]                                  # (TB, Vp) f32

    # Hoisted bias broadcasts (JAX does not CSE broadcast_in_dim inside loops).
    hb = jnp.broadcast_to(hb_ref[...], (tb, hdim))
    vb = jnp.broadcast_to(vb_ref[...], (tb, vdim))

    def v_to_h(v, u):
        # v @ W.T  ==  dot_general contracting v's dim 1 with W's dim 1 (NT).
        logits = lax.dot_general(
            v.astype(jnp.bfloat16), w,
            dimension_numbers=(((1,), (1,)), ((), ())),
            preferred_element_type=jnp.float32) + hb
        p_h = jax.nn.sigmoid(logits)
        return (u < p_h).astype(jnp.float32)         # Bernoulli(p_h)

    def h_to_v(h, u):
        # h @ W   ==  dot_general contracting h's dim 1 with W's dim 0 (NN).
        logits = lax.dot_general(
            h.astype(jnp.bfloat16), w,
            dimension_numbers=(((1,), (0,)), ((), ())),
            preferred_element_type=jnp.float32) + vb
        p_v = jax.nn.sigmoid(logits)
        return (u < p_v).astype(jnp.float32)         # Bernoulli(p_v)

    h1 = v_to_h(v0, uh_ref[0])

    def body(t, carry):
        _, h_cur = carry
        v_new = h_to_v(h_cur, uv_ref[t])
        h_new = v_to_h(v_new, uh_ref[t + 1])
        return (v_new, h_new)

    v_k, _ = lax.fori_loop(0, cd_k, body, (v0, h1))
    vk_ref[...] = v_k


def rbm_forward(v, W, v_bias, h_bias, key, cd_k=10, batch_tile=128):
    """v: (B, n_visible); W: (n_hidden, n_visible). Returns (v, v_k)."""
    B, V = v.shape
    H = W.shape[0]

    # Lane-dense padding (128 lanes) and sublane-aligned batch tiling.
    Vp = _round_up(V, 128)
    Hp = _round_up(H, 128)
    TB = min(batch_tile, _round_up(B, 8))
    Bp = _round_up(B, TB)

    # Zero-padded parameters: padded hidden/visible units carry zero weights
    # and zero biases, so they never influence the real units.
    Wp = jnp.zeros((Hp, Vp), jnp.bfloat16).at[:H, :V].set(W.astype(jnp.bfloat16))
    hbp = jnp.zeros((1, Hp), jnp.float32).at[0, :H].set(h_bias.astype(jnp.float32))
    vbp = jnp.zeros((1, Vp), jnp.float32).at[0, :V].set(v_bias.astype(jnp.float32))
    vp = jnp.zeros((Bp, Vp), jnp.float32).at[:B, :V].set(v.astype(jnp.float32))

    # Precomputed uniforms for every Bernoulli draw of the Gibbs chain.
    kh, kv = jax.random.split(key)
    u_h = jax.random.uniform(kh, (cd_k + 1, Bp, Hp), dtype=jnp.float32)
    u_v = jax.random.uniform(kv, (max(cd_k, 1), Bp, Vp), dtype=jnp.float32)

    grid = (Bp // TB,)
    kernel = functools.partial(rbm_kernel, cd_k=cd_k)

    # Explicit scoped-VMEM budget: double-buffered per-tile inputs/outputs plus
    # the resident weights, with headroom for activations.
    per_tile_bytes = (
        Wp.size * 2 + hbp.size * 4 + vbp.size * 4
        + 2 * TB * Vp * 4                       # v in, v_k out
        + (cd_k + 1) * TB * Hp * 4              # u_h tile
        + max(cd_k, 1) * TB * Vp * 4            # u_v tile
    )
    vmem_limit = int(min(100 << 20, max(32 << 20, 2 * per_tile_bytes + (4 << 20))))

    vk = pl.pallas_call(
        kernel,
        out_shape=jax.ShapeDtypeStruct((Bp, Vp), jnp.float32),
        grid=grid,
        in_specs=[
            pl.BlockSpec((TB, Vp), lambda i: (i, 0)),              # v tile
            pl.BlockSpec((Hp, Vp), lambda i: (0, 0)),              # W (resident)
            pl.BlockSpec((1, Hp), lambda i: (0, 0)),               # h_bias
            pl.BlockSpec((1, Vp), lambda i: (0, 0)),               # v_bias
            pl.BlockSpec((cd_k + 1, TB, Hp), lambda i: (0, i, 0)),  # hidden uniforms
            pl.BlockSpec((max(cd_k, 1), TB, Vp), lambda i: (0, i, 0)),  # visible uniforms
        ],
        out_specs=pl.BlockSpec((TB, Vp), lambda i: (i, 0)),
        compiler_params=pltpu.CompilerParams(
            dimension_semantics=("parallel",),
            vmem_limit_bytes=vmem_limit,
        ),
    )(vp, Wp, hbp, vbp, u_h, u_v)

    # The original v is returned untouched from the wrapper (no kernel output).
    return v, vk[:B, :V]


if __name__ == "__main__":
    # Small shapes consistent with the module defaults.
    n_visible, n_hidden, batch = 256, 64, 8
    cd_k = 10

    key = jax.random.PRNGKey(0)
    k_w, k_v, k_s = jax.random.split(key, 3)

    # Deterministic parameter init matching RBM.__init__:
    #   W ~ U(-1/(n_visible+n_hidden), 1/(n_visible+n_hidden)), biases = 0.
    bound = 1.0 / (n_visible + n_hidden)
    W = jax.random.uniform(k_w, (n_hidden, n_visible),
                           minval=-bound, maxval=bound, dtype=jnp.float32)
    v_bias = jnp.zeros((n_visible,), jnp.float32)
    h_bias = jnp.zeros((n_hidden,), jnp.float32)

    # Binary visible units, as typical for a Bernoulli RBM.
    v_in = (jax.random.uniform(k_v, (batch, n_visible)) > 0.5).astype(jnp.float32)

    v_out, v_k = rbm_forward(v_in, W, v_bias, h_bias, k_s, cd_k=cd_k)
    jax.block_until_ready((v_out, v_k))

    assert v_out.shape == (batch, n_visible)
    assert v_k.shape == (batch, n_visible)
    # v is passed through unchanged; v_k is a binary Gibbs sample.
    assert bool(jnp.all(v_out == v_in))
    assert bool(jnp.all((v_k == 0.0) | (v_k == 1.0)))

    print("KERNEL_OK")
</pallas_src>

<mosaic_0001>
module attributes {stable_mosaic.version = 11 : i64} {
  func.func @rbm_kernel(%arg0: i32, %arg1: memref<8x256xf32, #tpu.memory_space<vmem>>, %arg2: memref<128x256xbf16, #tpu.memory_space<vmem>>, %arg3: memref<1x128xf32, #tpu.memory_space<vmem>>, %arg4: memref<1x256xf32, #tpu.memory_space<vmem>>, %arg5: memref<11x8x128xf32, #tpu.memory_space<vmem>>, %arg6: memref<10x8x256xf32, #tpu.memory_space<vmem>>, %arg7: memref<8x256xf32, #tpu.memory_space<vmem>>) attributes {dimension_semantics = [#tpu.dimension_semantics<parallel>], iteration_bounds = array<i64: 1>, scalar_prefetch = 0 : i64, scratch_operands = 0 : i64, tpu.core_type = #tpu.core_type<tc>, window_params = [{transform_indices = @transform_0, window_bounds = array<i64: 8, 256>}, {pipeline_mode = #tpu.pipeline_mode<synchronous>, transform_indices = @transform_1, window_bounds = array<i64: 128, 256>}, {pipeline_mode = #tpu.pipeline_mode<synchronous>, transform_indices = @transform_2, window_bounds = array<i64: 1, 128>}, {pipeline_mode = #tpu.pipeline_mode<synchronous>, transform_indices = @transform_3, window_bounds = array<i64: 1, 256>}, {transform_indices = @transform_4, window_bounds = array<i64: 11, 8, 128>}, {transform_indices = @transform_5, window_bounds = array<i64: 10, 8, 256>}, {transform_indices = @transform_6, window_bounds = array<i64: 8, 256>}]} {
    %c0 = arith.constant 0 : index
    %c0_0 = arith.constant 0 : index
    %0 = vector.load %arg2[%c0, %c0_0] : memref<128x256xbf16, #tpu.memory_space<vmem>>, vector<128x256xbf16>
    %c0_1 = arith.constant 0 : index
    %c0_2 = arith.constant 0 : index
    %1 = vector.load %arg1[%c0_1, %c0_2] : memref<8x256xf32, #tpu.memory_space<vmem>>, vector<8x256xf32>
    %c0_3 = arith.constant 0 : index
    %c0_4 = arith.constant 0 : index
    %2 = vector.load %arg3[%c0_3, %c0_4] : memref<1x128xf32, #tpu.memory_space<vmem>>, vector<1x128xf32>
    %3 = vector.shape_cast %2 : vector<1x128xf32> to vector<1x128xf32>
    %4 = vector.broadcast %3 : vector<1x128xf32> to vector<8x128xf32>
    %c0_5 = arith.constant 0 : index
    %c0_6 = arith.constant 0 : index
    %5 = vector.load %arg4[%c0_5, %c0_6] : memref<1x256xf32, #tpu.memory_space<vmem>>, vector<1x256xf32>
    %6 = vector.shape_cast %5 : vector<1x256xf32> to vector<1x256xf32>
    %7 = vector.broadcast %6 : vector<1x256xf32> to vector<8x256xf32>
    %c0_7 = arith.constant 0 : index
    %c0_8 = arith.constant 0 : index
    %c0_9 = arith.constant 0 : index
    %8 = vector.load %arg5[%c0_7, %c0_8, %c0_9] : memref<11x8x128xf32, #tpu.memory_space<vmem>>, vector<1x8x128xf32>
    %9 = vector.shape_cast %8 : vector<1x8x128xf32> to vector<8x128xf32>
    %10 = arith.truncf %1 : vector<8x256xf32> to vector<8x256xbf16>
    %cst = arith.constant dense<0.000000e+00> : vector<8x128xf32>
    %11 = tpu.matmul %10, %0, %cst {dimension_numbers = #tpu.dot_dimension_numbers<[1], [1], [0], [0], [0, 0, 1, 0], [], []>} : vector<8x256xbf16>, vector<128x256xbf16>, vector<8x128xf32> -> vector<8x128xf32>
    %12 = arith.addf %11, %4 : vector<8x128xf32>
    %13 = arith.negf %12 : vector<8x128xf32>
    %14 = math.exp %13 : vector<8x128xf32>
    %cst_10 = arith.constant 1.000000e+00 : f32
    %15 = vector.broadcast %cst_10 : f32 to vector<8x128xf32>
    %16 = arith.addf %15, %14 : vector<8x128xf32>
    %17 = arith.divf %15, %16 : vector<8x128xf32>
    %18 = arith.cmpf olt, %9, %17 : vector<8x128xf32>
    %19 = arith.extui %18 : vector<8x128xi1> to vector<8x128xi32>
    %20 = arith.sitofp %19 : vector<8x128xi32> to vector<8x128xf32>
    %c0_i32 = arith.constant 0 : i32
    %c10_i32 = arith.constant 10 : i32
    %21 = arith.addi %c0_i32, %c10_i32 : i32
    %c1_i32 = arith.constant 1 : i32
    %22:2 = scf.for %arg8 = %c0_i32 to %21 step %c1_i32 iter_args(%arg9 = %1, %arg10 = %20) -> (vector<8x256xf32>, vector<8x128xf32>)  : i32 {
      %24 = arith.index_cast %arg8 : i32 to index
      %c0_14 = arith.constant 0 : index
      %c0_15 = arith.constant 0 : index
      %25 = vector.load %arg6[%24, %c0_14, %c0_15] : memref<10x8x256xf32, #tpu.memory_space<vmem>>, vector<1x8x256xf32>
      %26 = vector.shape_cast %25 : vector<1x8x256xf32> to vector<8x256xf32>
      %27 = arith.truncf %arg10 : vector<8x128xf32> to vector<8x128xbf16>
      %cst_16 = arith.constant dense<0.000000e+00> : vector<8x256xf32>
      %28 = tpu.matmul %27, %0, %cst_16 {dimension_numbers = #tpu.dot_dimension_numbers<[1], [0], [0], [1], [0, 0, 1, 1], [], []>} : vector<8x128xbf16>, vector<128x256xbf16>, vector<8x256xf32> -> vector<8x256xf32>
      %29 = arith.addf %28, %7 : vector<8x256xf32>
      %30 = arith.negf %29 : vector<8x256xf32>
      %31 = math.exp %30 : vector<8x256xf32>
      %cst_17 = arith.constant 1.000000e+00 : f32
      %32 = vector.broadcast %cst_17 : f32 to vector<8x256xf32>
      %33 = arith.addf %32, %31 : vector<8x256xf32>
      %34 = arith.divf %32, %33 : vector<8x256xf32>
      %35 = arith.cmpf olt, %26, %34 : vector<8x256xf32>
      %36 = arith.extui %35 : vector<8x256xi1> to vector<8x256xi32>
      %37 = arith.sitofp %36 : vector<8x256xi32> to vector<8x256xf32>
      %c1_i32_18 = arith.constant 1 : i32
      %38 = arith.addi %arg8, %c1_i32_18 : i32
      %39 = arith.index_cast %38 : i32 to index
      %c0_19 = arith.constant 0 : index
      %c0_20 = arith.constant 0 : index
      %40 = vector.load %arg5[%39, %c0_19, %c0_20] : memref<11x8x128xf32, #tpu.memory_space<vmem>>, vector<1x8x128xf32>
      %41 = vector.shape_cast %40 : vector<1x8x128xf32> to vector<8x128xf32>
      %42 = arith.truncf %37 : vector<8x256xf32> to vector<8x256xbf16>
      %cst_21 = arith.constant dense<0.000000e+00> : vector<8x128xf32>
      %43 = tpu.matmul %42, %0, %cst_21 {dimension_numbers = #tpu.dot_dimension_numbers<[1], [1], [0], [0], [0, 0, 1, 0], [], []>} : vector<8x256xbf16>, vector<128x256xbf16>, vector<8x128xf32> -> vector<8x128xf32>
      %44 = arith.addf %43, %4 : vector<8x128xf32>
      %45 = arith.negf %44 : vector<8x128xf32>
      %46 = math.exp %45 : vector<8x128xf32>
      %cst_22 = arith.constant 1.000000e+00 : f32
      %47 = vector.broadcast %cst_22 : f32 to vector<8x128xf32>
      %48 = arith.addf %47, %46 : vector<8x128xf32>
      %49 = arith.divf %47, %48 : vector<8x128xf32>
      %50 = arith.cmpf olt, %41, %49 : vector<8x128xf32>
      %51 = arith.extui %50 : vector<8x128xi1> to vector<8x128xi32>
      %52 = arith.sitofp %51 : vector<8x128xi32> to vector<8x128xf32>
      scf.yield %37, %52 : vector<8x256xf32>, vector<8x128xf32>
    }
    %c10_i32_11 = arith.constant 10 : i32
    %c0_12 = arith.constant 0 : index
    %c0_13 = arith.constant 0 : index
    %23 = vector.load %arg7[%c0_12, %c0_13] : memref<8x256xf32, #tpu.memory_space<vmem>>, vector<8x256xf32>
    tpu.vector_store %arg7[%c0_12, %c0_13], %22#0 {strides = array<i32>} : memref<8x256xf32, #tpu.memory_space<vmem>>, vector<8x256xf32>,
    return
  }
  func.func @transform_0(%arg0: i32) -> (i32, i32) {
    %c0_i32 = arith.constant 0 : i32
    %c0_i32_0 = arith.constant 0 : i32
    return %arg0, %c0_i32 : i32, i32
  }
  func.func @transform_1(%arg0: i32) -> (i32, i32) {
    %c0_i32 = arith.constant 0 : i32
    %c0_i32_0 = arith.constant 0 : i32
    %c0_i32_1 = arith.constant 0 : i32
    return %c0_i32, %c0_i32_0 : i32, i32
  }
  func.func @transform_2(%arg0: i32) -> (i32, i32) {
    %c0_i32 = arith.constant 0 : i32
    %c0_i32_0 = arith.constant 0 : i32
    %c0_i32_1 = arith.constant 0 : i32
    return %c0_i32, %c0_i32_0 : i32, i32
  }
  func.func @transform_3(%arg0: i32) -> (i32, i32) {
    %c0_i32 = arith.constant 0 : i32
    %c0_i32_0 = arith.constant 0 : i32
    %c0_i32_1 = arith.constant 0 : i32
    return %c0_i32, %c0_i32_0 : i32, i32
  }
  func.func @transform_4(%arg0: i32) -> (i32, i32, i32) {
    %c0_i32 = arith.constant 0 : i32
    %c0_i32_0 = arith.constant 0 : i32
    %c0_i32_1 = arith.constant 0 : i32
    return %c0_i32, %arg0, %c0_i32_0 : i32, i32, i32
  }
  func.func @transform_5(%arg0: i32) -> (i32, i32, i32) {
    %c0_i32 = arith.constant 0 : i32
    %c0_i32_0 = arith.constant 0 : i32
    %c0_i32_1 = arith.constant 0 : i32
    return %c0_i32, %arg0, %c0_i32_0 : i32, i32, i32
  }
  func.func @transform_6(%arg0: i32) -> (i32, i32) {
    %c0_i32 = arith.constant 0 : i32
    %c0_i32_0 = arith.constant 0 : i32
    return %arg0, %c0_i32 : i32, i32
  }
}

</mosaic_0001>

<bundles_post_ra>
// kernel: tpu_custom_call.1
= control target key start
LH: loop header
LB: loop body
LE: loop exit
PB: predicated region body
PF: predicated region fallthrough
CT: control target
= control target key end

     0   :  { %11 = vsyncpa [#allocation3], 0  ;;  %s815_s0 = inlined_call_operand.hbm [shape: f32[8,256], index: 0, kind: input, shape index: {}]   ;;  %s816_s1 = inlined_call_operand.hbm [shape: bf16[128,256], index: 1, kind: input, shape index: {}]   ;;  %s817_s2 = inlined_call_operand.vmem [shape: f32[1,128], index: 2, kind: input, shape index: {}]   ;;  %s818_s3 = inlined_call_operand.vmem [shape: f32[1,256], index: 3, kind: input, shape index: {}]   ;;  %s819_s4 = inlined_call_operand.hbm [shape: f32[11,8,128], index: 4, kind: input, shape index: {}]   ;;  %s820_s5 = inlined_call_operand.hbm [shape: f32[10,8,256], index: 5, kind: input, shape index: {}]   ;;  %s821_s6 = inlined_call_operand.hbm [shape: f32[8,256], index: 6, kind: output, shape index: {}]  }
   0x1   :  { %12 = vsyncpa [#allocation6], 0 }
   0x2   :  { %13 = vsyncpa [#allocation9], 0 }
   0x3   :  { %14 = vsyncpa [#allocation4], 0  ;;  %s641_s21 = smov [#allocation5]  }
   0x4   :  { %s30_s22 = sshll.u32 %s641_s21, 4  ;;  %s31_s22 = int_to_ptr.vmem [resolvable:$true] %s30_s22 }
   0x5   :  { %s525_s23 = scalar_lea.vmem %s31_s22, 2048  ;;  %p530_p1 = scmp.lt.s32.totalorder %s31_s22, %s31_s22 }
   0x6   :  { %p526_p0 = scmp.ne.s32.totalorder %s31_s22, %s525_s23  ;;  %p531_p2 = scmp.lt.s32.totalorder %s525_s23, %s525_s23 }
   0x8   :  { %p532_p3 = por %p531_p2, %p530_p1 }
   0xa   :  { %p533_p4 = pnand %p532_p3, %p526_p0 }
   0xc   :  { %536 = shalt.err (!%p533_p4)
}
   0xd   :  { %s642_s24 = smov 128   ;;  %s643_s25 = smov 8  }
   0xe   :  { %36 = dma.hbm_to_vmem [thread:$0]  %s816_s1, 2048, %s31_s22, [#allocation6], %s642_s24, %s642_s24, %s643_s25  }
   0xf   :  { %s644_s28 = smov [#allocation2]   ;;  %s645_s30 = smov [#allocation7]  }
  0x10   :  { %s21_s29 = sshll.u32 %s644_s28, 4  ;;  %s46_s7 = sshll.u32 %s645_s30, 4  ;;  %s22_s29 = int_to_ptr.vmem [resolvable:$true] %s21_s29  ;;  %s47_s7 = int_to_ptr.vmem [resolvable:$true] %s46_s7 }
  0x11   :  { %s545_s8 = scalar_lea.vmem %s22_s29, 256  ;;  %p550_p6 = scmp.lt.s32.totalorder %s22_s29, %s22_s29 }
  0x12   :  { %p546_p5 = scmp.ne.s32.totalorder %s22_s29, %s545_s8  ;;  %p551_p7 = scmp.lt.s32.totalorder %s545_s8, %s545_s8 }
  0x14   :  { %p552_p8 = por %p551_p7, %p550_p6 }
  0x16   :  { %p553_p9 = pnand %p552_p8, %p546_p5 }
  0x18   :  { %556 = shalt.err (!%p553_p9)
}
  0x19   :  { %24 = dma.hbm_to_vmem [thread:$0]  %s815_s0, 256, %s22_s29, [#allocation3]  }
  0x1a   :  { %s565_s11 = scalar_lea.vmem %s47_s7, 1408  ;;  %p570_p11 = scmp.lt.s32.totalorder %s47_s7, %s47_s7 }
  0x1b   :  { %p566_p10 = scmp.ne.s32.totalorder %s47_s7, %s565_s11  ;;  %p571_p12 = scmp.lt.s32.totalorder %s565_s11, %s565_s11 }
  0x1d   :  { %p572_p13 = por %p571_p12, %p570_p11 }
  0x1f   :  { %p573_p0 = pnand %p572_p13, %p566_p10 }
  0x21   :  { %576 = shalt.err (!%p573_p0)
}
  0x22   :  { %52 = dma.hbm_to_vmem [thread:$0]  %s819_s4, 1408, %s47_s7, [#allocation6], %s642_s24, %s642_s24, %s643_s25  }
  0x23   :  { %s646_s13 = smov [#allocation8]  }
  0x24   :  { %s58_s14 = sshll.u32 %s646_s13, 4  ;;  %s59_s14 = int_to_ptr.vmem [resolvable:$true] %s58_s14 }
  0x25   :  { %s585_s15 = scalar_lea.vmem %s59_s14, 2560  ;;  %p590_p2 = scmp.lt.s32.totalorder %s59_s14, %s59_s14 }
  0x26   :  { %p586_p1 = scmp.ne.s32.totalorder %s59_s14, %s585_s15  ;;  %p591_p3 = scmp.lt.s32.totalorder %s585_s15, %s585_s15 }
  0x28   :  { %p592_p4 = por %p591_p3, %p590_p2 }
  0x2a   :  { %p593_p5 = pnand %p592_p4, %p586_p1 }
  0x2c   :  { %596 = shalt.err (!%p593_p5)
}
  0x2d   :  { %s647_s0 = smov 256   ;;  %s648_s16 = smov 16  }
  0x2e   :  { %64 = dma.hbm_to_vmem [thread:$0]  %s820_s5, 2560, %s59_s14, [#allocation9], %s647_s0, %s647_s0, %s648_s16  }
  0x2f   :  { %625 = dma.done.wait [#allocation3], 256  }
  0x30   :  { %626 = vsyncadd [#allocation3], 4294967040 }
  0x31   :  { %627 = dma.done.wait [#allocation6], 3456  }
  0x32   :  { %628 = vsyncadd [#allocation6], 4294963840 }
  0x33   :  { %629 = dma.done.wait [#allocation9], 2560  }
  0x34   :  { %630 = vsyncadd [#allocation9], 4294964736  ;;  %v105_v0 = vlaneseq  ;;  %v103_v4 = vld [vmem:[%s818_s3] sm:$0x3]  ;;  %v708_v7 = vld [vmem:[#allocation5 + $0x74] ss:$8 sps:$4 sm:$0xff]  }
  0x35   :  { %v710_v8 = vld [vmem:[#allocation5 + $0x70] ss:$8 sps:$4 sm:$0xff]   ;;  %v712_v9 = vld [vmem:[#allocation5 + $0x64] ss:$8 sps:$4 sm:$0xff]   ;;  %198 = vmatprep.subr.bf16.mxu0 %v708_v7  ;;  %v717_v10 = vld [vmem:[#allocation5 + $0x60] ss:$8 sps:$4 sm:$0xff]  }
  0x36   :  { %v106_v1 = vshrl.u32 %v105_v0, 7  ;;  %199 = vmatpush1.bf16.xpose.msra.mxu0 %v710_v8  ;;  %v719_v11 = vld [vmem:[#allocation5 + $0x54] ss:$8 sps:$4 sm:$0xff]   ;;  %v723_v14 = vld [vmem:[#allocation5 + $0x50] ss:$8 sps:$4 sm:$0xff]   ;;  %v115_v36 = vld [vmem:[#allocation7] sm:$0xff] }
  0x37   :  { %200 = vmatprep.subr.bf16.mxu0 %v712_v9  ;;  %v95_v12 = vld [vmem:[#allocation2 + $0x8] sm:$0xff]  ;;  %v725_v15 = vld [vmem:[#allocation5 + $0x44] ss:$8 sps:$4 sm:$0xff]   ;;  %v729_v16 = vld [vmem:[#allocation5 + $0x40] ss:$8 sps:$4 sm:$0xff]   ;;  %v649_v38 = vmov 0.0  }
  0x38   :  { %v107_v2 = vsub.s32 0, %v106_v1  ;;  %v111_v3 = vsub.s32 1, %v106_v1  ;;  %v117_v13 = vpack.c.bf16 %v95_v12, %v95_v12  ;;  %v731_v17 = vld [vmem:[#allocation5 + $0x34] ss:$8 sps:$4 sm:$0xff]   ;;  %v735_v18 = vld [vmem:[#allocation5 + $0x30] ss:$8 sps:$4 sm:$0xff]  }
  0x39   :  { %v737_v19 = vld [vmem:[#allocation5 + $0x24] ss:$8 sps:$4 sm:$0xff]   ;;  %v741_v20 = vld [vmem:[#allocation5 + $0x20] ss:$8 sps:$4 sm:$0xff]   ;;  %v743_v21 = vld [vmem:[#allocation5 + $0x14] ss:$8 sps:$4 sm:$0xff]  }
  0x3a   :  { %v704_v5 = vrot.slane %v103_v4, %v107_v2  ;;  %v706_v6 = vrot.slane %v103_v4, %v111_v3  ;;  %230 = vmatprep.mubr.bf16.mxu0 %v117_v13  ;;  %v747_v22 = vld [vmem:[#allocation5 + $0x10] ss:$8 sps:$4 sm:$0xff]   ;;  %v749_v23 = vld [vmem:[#allocation5 + $0x4] ss:$8 sps:$4 sm:$0xff]   ;;  %v753_v24 = vld [vmem:[#allocation5] ss:$8 sps:$4 sm:$0xff]  }
  0x3b   :  { %v94_v25 = vld [vmem:[#allocation2] sm:$0xff] }
  0x3c   :  { %v116_v26 = vpack.c.bf16 %v94_v25, %v94_v25  ;;  %v759_v27 = vld [vmem:[%s817_s2] ss:$0 sm:$0xff]  ;;  %s764_s2 = smov 0  }
  0x3e   :  { %201 = vmatpush1.bf16.xpose.msra.mxu0 %v717_v10 }
  0x3f   :  { %202 = vmatprep.subr.bf16.mxu0 %v719_v11 }
  0x46   :  { %203 = vmatpush1.bf16.xpose.msra.mxu0 %v723_v14 }
  0x47   :  { %204 = vmatprep.subr.bf16.mxu0 %v725_v15 }
  0x4e   :  { %205 = vmatpush1.bf16.xpose.msra.mxu0 %v729_v16 }
  0x4f   :  { %206 = vmatprep.subr.bf16.mxu0 %v731_v17 }
  0x56   :  { %207 = vmatpush1.bf16.xpose.msra.mxu0 %v735_v18 }
  0x57   :  { %208 = vmatprep.subr.bf16.mxu0 %v737_v19 }
  0x5e   :  { %209 = vmatpush1.bf16.xpose.msra.mxu0 %v741_v20 }
  0x5f   :  { %210 = vmatprep.subr.bf16.mxu0 %v743_v21 }
  0x66   :  { %211 = vmatpush1.bf16.xpose.msra.mxu0 %v747_v22 }
  0x67   :  { %212 = vmatprep.subr.bf16.mxu0 %v749_v23 }
  0x6e   :  { %213 = vmatpush1.bf16.xpose.msra.mxu0 %v753_v24 }
  0x75   :  { %231 = vmatmul.mubr.bf16.vlgmr.msra.gmra.mxu0 %v116_v26 }
 0x135   :  { %v232_v28 = vpop.f32.mrf.mxu0 }
 0x136   :  { %v233_v29 = vadd.f32 %v759_v27, %v232_v28 }
 0x137   :  { %v234_v30 = vpop.f32.mrf.mxu0 }
 0x138   :  { %v431_v31 = vmul.f32 -1.442695, %v233_v29 }
 0x139   :  { %v235_v32 = vpop.f32.mrf.mxu0 }
 0x13a   :  { %501 = vpow2.f32 %v431_v31 }
 0x13b   :  { %v236_v33 = vpop.f32.mrf.mxu0 }
 0x147   :  { %v502_v34 = vpop.eup %501 }
 0x148   :  { %v241_v35 = vadd.f32 1.0, %v502_v34 }
 0x14a   :  { %503 = vrcp.f32 %v241_v35 }
 0x157   :  { %v504_v37 = vpop.eup %503 }
 0x158   :  { %vm244_vm0 = vcmp.lt.f32.partialorder %v115_v36, %v504_v37 }
 0x159   :  { %v432_v39 = vsel %vm244_vm0, 1.0, %v649_v38  }
 0x15a LB: > { %262 = vmatprep.subr.bf16.mxu0 %v708_v7  ;;  %327 = vmatprep.subr.bf16.mxu1 %v708_v7  ;;  %v650_v40 = vmov 0   ;;  %v261_v41 = vpack.c.bf16 %v635_v39, %v635_v39  ;;  %s447_s20 = sshll.u32 %s639_s2, 4  ;;  %v651_v58 = vmov 0.0   ;;  %v652_v61 = vmov 1.0|1.0   ;;  %s439_s22 = sshll.u32 %s639_s2, 3  ;;  %s639_s2 = sphi %s764_s2, %s252_s2   ;;  %v635_v39 = vphi %v432_v39, %v446_v39  }
 0x15b   : > { %263 = vmatpush1.bf16.msra.mxu0 %v710_v8  ;;  %294 = vmatprep.mubr.bf16.mxu0 %v650_v40  ;;  %s258_s21 = scalar_lea.vmem [#allocation8], %s447_s20  ;;  %s398_s23 = scalar_lea.vmem [#allocation7], %s439_s22 }
 0x15c   : > { %264 = vmatprep.subr.bf16.mxu0 %v712_v9  ;;  %328 = vmatpush1.bf16.xpose.msra.mxu1 %v710_v8  ;;  %v259_v54 = vld [vmem:[%s258_s21] sm:$0xff]  ;;  %v260_v56 = vld [vmem:[%s258_s21 + $0x8] sm:$0xff]  ;;  %s252_s2 = sadd.s32 1, %s639_s2  }
 0x15d   : > { %329 = vmatprep.subr.bf16.mxu1 %v712_v9  ;;  %v440_v13 = vld [vmem:[%s398_s23 + $0x8] sm:$0xff]  ;;  %p249_p6 = scmp.ge.s32.totalorder %s252_s2, 10  }
 0x15e   :  { %s653_s24 = smov (%p249_p6), [#allocation10]  }
 0x15f   : > { %265 = vmatpush1.bf16.msra.mxu0 %v717_v10  ;;  %s384_s25 = sshll.u32 (%p249_p6), %s653_s24, 4  ;;  %s385_s25 = int_to_ptr.vmem [resolvable:$true] %s384_s25 }
 0x160   : > { %266 = vmatprep.subr.bf16.mxu0 %v719_v11  ;;  %s597_s26 = scalar_lea.vmem (%p249_p6), %s385_s25, 256  ;;  %p602_p8 = scmp.lt.s32.totalorder (%p249_p6), %s385_s25, %s385_s25 }
 0x161   :  { %p598_p7 = scmp.ne.s32.totalorder (%p249_p6), %s385_s25, %s597_s26  ;;  %p603_p9 = scmp.lt.s32.totalorder (%p249_p6), %s597_s26, %s597_s26 }
 0x163   : > { %267 = vmatpush1.bf16.msra.mxu0 %v723_v14  ;;  %p604_p10 = por (%p249_p6), %p603_p9, %p602_p8 }
 0x164   : > { %268 = vmatprep.subr.bf16.mxu0 %v725_v15  ;;  %330 = vmatpush1.bf16.xpose.msra.mxu1 %v717_v10 }
 0x165   : > { %331 = vmatprep.subr.bf16.mxu1 %v719_v11  ;;  %p605_p11 = pnand (%p249_p6), %p604_p10, %p598_p7 }
 0x167   : > { %269 = vmatpush1.bf16.msra.mxu0 %v729_v16 }
 0x168   : > { %270 = vmatprep.subr.bf16.mxu0 %v731_v17 }
 0x16b   : > { %271 = vmatpush1.bf16.msra.mxu0 %v735_v18 }
 0x16c   : > { %272 = vmatprep.subr.bf16.mxu0 %v737_v19  ;;  %332 = vmatpush1.bf16.xpose.msra.mxu1 %v723_v14 }
 0x16d   : > { %333 = vmatprep.subr.bf16.mxu1 %v725_v15 }
 0x16f   : > { %273 = vmatpush1.bf16.msra.mxu0 %v741_v20 }
 0x170   : > { %274 = vmatprep.subr.bf16.mxu0 %v743_v21 }
 0x173   : > { %275 = vmatpush1.bf16.msra.mxu0 %v747_v22 }
 0x174   : > { %276 = vmatprep.subr.bf16.mxu0 %v749_v23  ;;  %334 = vmatpush1.bf16.xpose.msra.mxu1 %v729_v16 }
 0x175   : > { %335 = vmatprep.subr.bf16.mxu1 %v731_v17 }
 0x177   : > { %277 = vmatpush1.bf16.msra.mxu0 %v753_v24 }
 0x17a   : > { %295 = vmatmul.mubr.bf16.vlgmr.msra.gmra.mxu0 %v261_v41 }
 0x17c   : > { %336 = vmatpush1.bf16.xpose.msra.mxu1 %v735_v18 }
 0x17d   : > { %337 = vmatprep.subr.bf16.mxu1 %v737_v19 }
 0x184   : > { %338 = vmatpush1.bf16.xpose.msra.mxu1 %v741_v20 }
 0x185   : > { %339 = vmatprep.subr.bf16.mxu1 %v743_v21 }
 0x18c   : > { %340 = vmatpush1.bf16.xpose.msra.mxu1 %v747_v22 }
 0x18d   : > { %341 = vmatprep.subr.bf16.mxu1 %v749_v23 }
 0x194   : > { %342 = vmatpush1.bf16.xpose.msra.mxu1 %v753_v24 }
 0x23a   : > { %v296_v42 = vpop.f32.mrf.mxu0 }
 0x23b   : > { %v297_v43 = vadd.f32 %v296_v42, %v704_v5 }
 0x23c   : > { %v298_v44 = vpop.f32.mrf.mxu0 }
 0x23d   : > { %v435_v45 = vmul.f32 -1.442695, %v297_v43  ;;  %v299_v46 = vadd.f32 %v298_v44, %v706_v6 }
 0x23e   : > { %v300_v47 = vpop.f32.mrf.mxu0 }
 0x23f   : > { %505 = vpow2.f32 %v435_v45  ;;  %v436_v48 = vmul.f32 -1.442695, %v299_v46 }
 0x240   : > { %v301_v49 = vpop.f32.mrf.mxu0 }
 0x241   : > { %507 = vpow2.f32 %v436_v48 }
 0x24c   : > { %v506_v50 = vpop.eup %505 }
 0x24d   : > { %v309_v51 = vadd.f32 1.0, %v506_v50 }
 0x24e   : > { %v508_v52 = vpop.eup %507 }
 0x24f   : > { %509 = vrcp.f32 %v309_v51  ;;  %v310_v53 = vadd.f32 1.0, %v508_v52 }
 0x251   : > { %511 = vrcp.f32 %v310_v53 }
 0x25c   : > { %v510_v55 = vpop.eup %509 }
 0x25d   : > { %vm315_vm1 = vcmp.lt.f32.partialorder %v259_v54, %v510_v55 }
 0x25e   : > { %v512_v57 = vpop.eup %511  ;;  %v437_v59 = vsel %vm315_vm1, 1.0, %v651_v58  ;;  %vm443_vm4 = vmpackc.low %vm315_vm1, %vm315_vm1 }
 0x25f   : > { %vm316_vm2 = vcmp.lt.f32.partialorder %v260_v56, %v512_v57  ;;  %376 = vst [vmem:[#allocation10] sm:$0xff] (%p249_p6), %v437_v59 }
 0x260   : > { %v438_v60 = vsel %vm316_vm2, 1.0, %v651_v58  ;;  %vm441_vm3 = vmpackc.low %vm316_vm2, %vm316_vm2 }
 0x261   : > { %442 = vmatprep.mubr.msk.bf16.mxu1 %vm441_vm3, %v652_v61  ;;  %377 = vst [vmem:[#allocation10 + $0x8] sm:$0xff] (%p249_p6), %v438_v60 }
 0x262   : > { %444 = vmatmul.mubr.msk.bf16.vlgmr.msra.gmra.mxu1 %vm443_vm4, %v652_v61 }
 0x322   : > { %v361_v62 = vpop.f32.mrf.mxu1 }
 0x323   : > { %v362_v63 = vadd.f32 %v759_v27, %v361_v62 }
 0x324   : > { %v363_v0 = vpop.f32.mrf.mxu1 }
 0x325   : > { %v445_v1 = vmul.f32 -1.442695, %v362_v63 }
 0x326   : > { %v364_v2 = vpop.f32.mrf.mxu1 }
 0x327   : > { %513 = vpow2.f32 %v445_v1 }
 0x328   : > { %v365_v3 = vpop.f32.mrf.mxu1 }
 0x334   : > { %v514_v4 = vpop.eup %513 }
 0x335   : > { %v370_v12 = vadd.f32 1.0, %v514_v4 }
 0x337   : > { %515 = vrcp.f32 %v370_v12 }
 0x342   :  { %251 = sbr.rel (!%p249_p6) target bundleno = 346 (0x15a), region = 69 }
 0x344   : > { %v516_v25 = vpop.eup %515 }
 0x345   : > { %vm373_vm5 = vcmp.lt.f32.partialorder %v440_v13, %v516_v25 }
 0x346   : > { %v446_v39 = vsel %vm373_vm5, 1.0, %v651_v58  }
 0x347   :  { %608 = shalt.err (!%p605_p11)
}
 0x348   :  { %387 = dma.vmem_to_hbm [thread:$0]  %s385_s25, 256, %s821_s6, [#allocation4]  }
 0x349   :  { %631 = dma.done.wait [#allocation4], 256  }
 0x34a   :  { %632 = vsyncadd [#allocation4], 4294967040 }
 0x34b   :  { %391 = vsyncpa [#allocation3], 1 }
 0x34c   :  { %392 = vsyncpa [#allocation6], 1 }
 0x34d   :  { %393 = vsyncpa [#allocation9], 1 }
 0x34e   :  { %394 = vsyncpa [#allocation4], 1 }

</bundles_post_ra>
